<compile_context>
chip_gen: v7x
topology: tpu7x:2x2x1
jax: 0.10.0
libtpu: 0.0.40
codegen_flags: <defaults>
</compile_context>

<pallas_src>
import jax
import jax.numpy as jnp
from jax.experimental import pallas as pl
from jax.experimental.pallas import tpu as pltpu


def _round_up(n, m):
    return ((n + m - 1) // m) * m


def _pad2(a, rows, cols):
    r, c = a.shape
    if r == rows and c == cols:
        return a
    return jnp.pad(a, ((0, rows - r), (0, cols - c)))


def mlp_kernel(x_ref, w1_ref, b1_ref, w2_ref, b2_ref, w3_ref, b3_ref, o_ref):
    x = x_ref[...]
    # fc1 + ReLU  (MXU matmul, f32 accumulate; bias/ReLU on VPU)
    h1 = jnp.dot(x, w1_ref[...], preferred_element_type=jnp.float32) + b1_ref[...]
    h1 = jnp.maximum(h1, 0.0)
    # fc2 + ReLU
    h2 = jnp.dot(h1, w2_ref[...], preferred_element_type=jnp.float32) + b2_ref[...]
    h2 = jnp.maximum(h2, 0.0)
    # fc3 (no activation)
    out = jnp.dot(h2, w3_ref[...], preferred_element_type=jnp.float32) + b3_ref[...]
    o_ref[...] = out.astype(o_ref.dtype)


def mlp_forward(x, params, *, tm=128, lane=128):
    """Fused MLP forward. Pads M/K/N to MXU/lane-aligned shapes, tiles batch.

    Weights stay whole-VMEM-resident (fine for the spec's small hidden sizes).
    # TODO(synk): for large hidden sizes (v7x: 64 MiB VMEM), switch to a K/N
    # tiled grid with an f32 accumulator scratch instead of whole-resident
    # weights.
    """
    w1, b1, w2, b2, w3, b3 = params
    batch, k_in = x.shape
    hidden = w1.shape[1]
    out_size = w3.shape[1]

    Mp = _round_up(batch, tm)
    Kp = _round_up(k_in, lane)
    Hp = _round_up(hidden, lane)
    Np = _round_up(out_size, lane)

    xp = _pad2(x, Mp, Kp)
    w1p, b1p = _pad2(w1, Kp, Hp), _pad2(b1, 1, Hp)
    w2p, b2p = _pad2(w2, Hp, Hp), _pad2(b2, 1, Hp)
    w3p, b3p = _pad2(w3, Hp, Np), _pad2(b3, 1, Np)

    num_m = Mp // tm

    flops = 2 * Mp * (Kp * Hp + Hp * Hp + Hp * Np)
    bytes_accessed = 4 * (Mp * Kp + Kp * Hp + Hp * Hp + Hp * Np
                          + 2 * Hp + Np + Mp * Np)

    out = pl.pallas_call(
        mlp_kernel,
        out_shape=jax.ShapeDtypeStruct((Mp, Np), x.dtype),
        grid=(num_m,),
        in_specs=[
            pl.BlockSpec((tm, Kp), lambda i: (i, 0)),   # x: tiled over batch
            pl.BlockSpec((Kp, Hp), lambda i: (0, 0)),   # w1: resident
            pl.BlockSpec((1, Hp), lambda i: (0, 0)),    # b1: resident
            pl.BlockSpec((Hp, Hp), lambda i: (0, 0)),   # w2: resident
            pl.BlockSpec((1, Hp), lambda i: (0, 0)),    # b2: resident
            pl.BlockSpec((Hp, Np), lambda i: (0, 0)),   # w3: resident
            pl.BlockSpec((1, Np), lambda i: (0, 0)),    # b3: resident
        ],
        out_specs=pl.BlockSpec((tm, Np), lambda i: (i, 0)),
        compiler_params=pltpu.CompilerParams(
            dimension_semantics=("parallel",)),
        cost_estimate=pl.CostEstimate(
            flops=flops, transcendentals=0, bytes_accessed=bytes_accessed),
    )(xp, w1p, b1p, w2p, b2p, w3p, b3p)

    return out[:batch, :out_size]


def init_params(key, input_size, hidden_size, output_size, dtype=jnp.float32):
    """Deterministic init mimicking nn.Linear's U(-1/sqrt(fan_in), 1/sqrt(fan_in))."""
    ks = jax.random.split(key, 6)

    def linear(kw, kb, fan_in, fan_out):
        bound = 1.0 / jnp.sqrt(fan_in)
        w = jax.random.uniform(kw, (fan_in, fan_out), dtype, -bound, bound)
        b = jax.random.uniform(kb, (1, fan_out), dtype, -bound, bound)
        return w, b

    w1, b1 = linear(ks[0], ks[1], input_size, hidden_size)
    w2, b2 = linear(ks[2], ks[3], hidden_size, hidden_size)
    w3, b3 = linear(ks[4], ks[5], hidden_size, output_size)
    return (w1, b1, w2, b2, w3, b3)


if __name__ == "__main__":
    input_size, hidden_size, output_size = 16, 32, 8
    batch = 8

    key = jax.random.PRNGKey(0)
    k_x, k_p = jax.random.split(key)
    x = jax.random.normal(k_x, (batch, input_size), jnp.float32)
    params = init_params(k_p, input_size, hidden_size, output_size)

    out = mlp_forward(x, params)
    jax.block_until_ready(out)

    # Pure-JAX reference (same math as the PyTorch forward).
    w1, b1, w2, b2, w3, b3 = params
    ref = jnp.maximum(x @ w1 + b1, 0.0)
    ref = jnp.maximum(ref @ w2 + b2, 0.0)
    ref = ref @ w3 + b3
    assert out.shape == (batch, output_size)
    assert jnp.allclose(out, ref, atol=1e-5, rtol=1e-5)

    print("KERNEL_OK")
</pallas_src>

<mosaic_0001>
module attributes {stable_mosaic.version = 11 : i64} {
  func.func @mlp_kernel(%arg0: i32, %arg1: memref<128x128xf32, #tpu.memory_space<vmem>>, %arg2: memref<128x128xf32, #tpu.memory_space<vmem>>, %arg3: memref<1x128xf32, #tpu.memory_space<vmem>>, %arg4: memref<128x128xf32, #tpu.memory_space<vmem>>, %arg5: memref<1x128xf32, #tpu.memory_space<vmem>>, %arg6: memref<128x128xf32, #tpu.memory_space<vmem>>, %arg7: memref<1x128xf32, #tpu.memory_space<vmem>>, %arg8: memref<128x128xf32, #tpu.memory_space<vmem>>) attributes {dimension_semantics = [#tpu.dimension_semantics<parallel>], iteration_bounds = array<i64: 1>, scalar_prefetch = 0 : i64, scratch_operands = 0 : i64, tpu.core_type = #tpu.core_type<tc>, window_params = [{transform_indices = @transform_0, window_bounds = array<i64: 128, 128>}, {pipeline_mode = #tpu.pipeline_mode<synchronous>, transform_indices = @transform_1, window_bounds = array<i64: 128, 128>}, {pipeline_mode = #tpu.pipeline_mode<synchronous>, transform_indices = @transform_2, window_bounds = array<i64: 1, 128>}, {pipeline_mode = #tpu.pipeline_mode<synchronous>, transform_indices = @transform_3, window_bounds = array<i64: 128, 128>}, {pipeline_mode = #tpu.pipeline_mode<synchronous>, transform_indices = @transform_4, window_bounds = array<i64: 1, 128>}, {pipeline_mode = #tpu.pipeline_mode<synchronous>, transform_indices = @transform_5, window_bounds = array<i64: 128, 128>}, {pipeline_mode = #tpu.pipeline_mode<synchronous>, transform_indices = @transform_6, window_bounds = array<i64: 1, 128>}, {transform_indices = @transform_7, window_bounds = array<i64: 128, 128>}]} {
    %c0 = arith.constant 0 : index
    %c0_0 = arith.constant 0 : index
    %0 = vector.load %arg1[%c0, %c0_0] : memref<128x128xf32, #tpu.memory_space<vmem>>, vector<128x128xf32>
    %c0_1 = arith.constant 0 : index
    %c0_2 = arith.constant 0 : index
    %1 = vector.load %arg2[%c0_1, %c0_2] : memref<128x128xf32, #tpu.memory_space<vmem>>, vector<128x128xf32>
    %cst = arith.constant dense<0.000000e+00> : vector<128x128xf32>
    %2 = tpu.matmul %0, %1, %cst {dimension_numbers = #tpu.dot_dimension_numbers<[1], [0], [0], [1], [0, 0, 1, 1], [], []>} : vector<128x128xf32>, vector<128x128xf32>, vector<128x128xf32> -> vector<128x128xf32>
    %c0_3 = arith.constant 0 : index
    %c0_4 = arith.constant 0 : index
    %3 = vector.load %arg3[%c0_3, %c0_4] : memref<1x128xf32, #tpu.memory_space<vmem>>, vector<1x128xf32>
    %4 = vector.broadcast %3 : vector<1x128xf32> to vector<128x128xf32>
    %5 = arith.addf %2, %4 : vector<128x128xf32>
    %cst_5 = arith.constant 0.000000e+00 : f32
    %6 = vector.broadcast %cst_5 : f32 to vector<128x128xf32>
    %7 = arith.maximumf %5, %6 : vector<128x128xf32>
    %c0_6 = arith.constant 0 : index
    %c0_7 = arith.constant 0 : index
    %8 = vector.load %arg4[%c0_6, %c0_7] : memref<128x128xf32, #tpu.memory_space<vmem>>, vector<128x128xf32>
    %cst_8 = arith.constant dense<0.000000e+00> : vector<128x128xf32>
    %9 = tpu.matmul %7, %8, %cst_8 {dimension_numbers = #tpu.dot_dimension_numbers<[1], [0], [0], [1], [0, 0, 1, 1], [], []>} : vector<128x128xf32>, vector<128x128xf32>, vector<128x128xf32> -> vector<128x128xf32>
    %c0_9 = arith.constant 0 : index
    %c0_10 = arith.constant 0 : index
    %10 = vector.load %arg5[%c0_9, %c0_10] : memref<1x128xf32, #tpu.memory_space<vmem>>, vector<1x128xf32>
    %11 = vector.broadcast %10 : vector<1x128xf32> to vector<128x128xf32>
    %12 = arith.addf %9, %11 : vector<128x128xf32>
    %cst_11 = arith.constant 0.000000e+00 : f32
    %13 = vector.broadcast %cst_11 : f32 to vector<128x128xf32>
    %14 = arith.maximumf %12, %13 : vector<128x128xf32>
    %c0_12 = arith.constant 0 : index
    %c0_13 = arith.constant 0 : index
    %15 = vector.load %arg6[%c0_12, %c0_13] : memref<128x128xf32, #tpu.memory_space<vmem>>, vector<128x128xf32>
    %cst_14 = arith.constant dense<0.000000e+00> : vector<128x128xf32>
    %16 = tpu.matmul %14, %15, %cst_14 {dimension_numbers = #tpu.dot_dimension_numbers<[1], [0], [0], [1], [0, 0, 1, 1], [], []>} : vector<128x128xf32>, vector<128x128xf32>, vector<128x128xf32> -> vector<128x128xf32>
    %c0_15 = arith.constant 0 : index
    %c0_16 = arith.constant 0 : index
    %17 = vector.load %arg7[%c0_15, %c0_16] : memref<1x128xf32, #tpu.memory_space<vmem>>, vector<1x128xf32>
    %18 = vector.broadcast %17 : vector<1x128xf32> to vector<128x128xf32>
    %19 = arith.addf %16, %18 : vector<128x128xf32>
    %c0_17 = arith.constant 0 : index
    %c0_18 = arith.constant 0 : index
    %20 = vector.load %arg8[%c0_17, %c0_18] : memref<128x128xf32, #tpu.memory_space<vmem>>, vector<128x128xf32>
    tpu.vector_store %arg8[%c0_17, %c0_18], %19 {strides = array<i32>} : memref<128x128xf32, #tpu.memory_space<vmem>>, vector<128x128xf32>,
    return
  }
  func.func @transform_0(%arg0: i32) -> (i32, i32) {
    %c0_i32 = arith.constant 0 : i32
    %c0_i32_0 = arith.constant 0 : i32
    return %arg0, %c0_i32 : i32, i32
  }
  func.func @transform_1(%arg0: i32) -> (i32, i32) {
    %c0_i32 = arith.constant 0 : i32
    %c0_i32_0 = arith.constant 0 : i32
    %c0_i32_1 = arith.constant 0 : i32
    return %c0_i32, %c0_i32_0 : i32, i32
  }
  func.func @transform_2(%arg0: i32) -> (i32, i32) {
    %c0_i32 = arith.constant 0 : i32
    %c0_i32_0 = arith.constant 0 : i32
    %c0_i32_1 = arith.constant 0 : i32
    return %c0_i32, %c0_i32_0 : i32, i32
  }
  func.func @transform_3(%arg0: i32) -> (i32, i32) {
    %c0_i32 = arith.constant 0 : i32
    %c0_i32_0 = arith.constant 0 : i32
    %c0_i32_1 = arith.constant 0 : i32
    return %c0_i32, %c0_i32_0 : i32, i32
  }
  func.func @transform_4(%arg0: i32) -> (i32, i32) {
    %c0_i32 = arith.constant 0 : i32
    %c0_i32_0 = arith.constant 0 : i32
    %c0_i32_1 = arith.constant 0 : i32
    return %c0_i32, %c0_i32_0 : i32, i32
  }
  func.func @transform_5(%arg0: i32) -> (i32, i32) {
    %c0_i32 = arith.constant 0 : i32
    %c0_i32_0 = arith.constant 0 : i32
    %c0_i32_1 = arith.constant 0 : i32
    return %c0_i32, %c0_i32_0 : i32, i32
  }
  func.func @transform_6(%arg0: i32) -> (i32, i32) {
    %c0_i32 = arith.constant 0 : i32
    %c0_i32_0 = arith.constant 0 : i32
    %c0_i32_1 = arith.constant 0 : i32
    return %c0_i32, %c0_i32_0 : i32, i32
  }
  func.func @transform_7(%arg0: i32) -> (i32, i32) {
    %c0_i32 = arith.constant 0 : i32
    %c0_i32_0 = arith.constant 0 : i32
    return %arg0, %c0_i32 : i32, i32
  }
}

</mosaic_0001>

<bundles_post_ra>
// kernel: tpu_custom_call.1
= control target key start
LH: loop header
LB: loop body
LE: loop exit
PB: predicated region body
PF: predicated region fallthrough
CT: control target
= control target key end

     0   :  { %12 = vsyncpa [#allocation3], 0  ;;  %s1360_s0 = inlined_call_operand.hbm [shape: f32[128,128], index: 0, kind: input, shape index: {}]   ;;  %s1361_s1 = inlined_call_operand.hbm [shape: f32[128,128], index: 1, kind: input, shape index: {}]   ;;  %s1362_s2 = inlined_call_operand.vmem [shape: f32[1,128], index: 2, kind: input, shape index: {}]   ;;  %s1363_s3 = inlined_call_operand.hbm [shape: f32[128,128], index: 3, kind: input, shape index: {}]   ;;  %s1364_s4 = inlined_call_operand.vmem [shape: f32[1,128], index: 4, kind: input, shape index: {}]   ;;  %s1365_s5 = inlined_call_operand.hbm [shape: f32[128,128], index: 5, kind: input, shape index: {}]   ;;  %s1366_s6 = inlined_call_operand.vmem [shape: f32[1,128], index: 6, kind: input, shape index: {}]   ;;  %s1367_s7 = inlined_call_operand.hbm [shape: f32[128,128], index: 7, kind: output, shape index: {}]  }
   0x1   :  { %13 = vsyncpa [#allocation6], 0 }
   0x2   :  { %14 = vsyncpa [#allocation9], 0 }
   0x3   :  { %15 = vsyncpa [#allocation4], 0  ;;  %s1173_s24 = smov [#allocation5]   ;;  %s1174_s26 = smov [#allocation2]  }
   0x4   :  { %s33_s25 = sshll.u32 %s1173_s24, 4  ;;  %s21_s27 = sshll.u32 %s1174_s26, 4  ;;  %s34_s25 = int_to_ptr.vmem [resolvable:$true] %s33_s25  ;;  %s1220_s27 = int_to_ptr.vmem [resolvable:$true] %s21_s27 }
   0x5   :  { %s1055_s30 = scalar_lea.hbm %s1361_s1, 2048 }
   0x6   :  { %p1056_p0 = scmp.ne.s32.totalorder %s1361_s1, %s1055_s30  ;;  %p1059_p1 = scmp.lt.u32.totalorder %s1055_s30, %s1361_s1 }
   0x8   :  { %p1061_p2 = pnand %p1059_p1, %p1056_p0 }
   0xa   :  { %1064 = shalt.err (!%p1061_p2)
}
   0xb   :  { %s1065_s12 = scalar_lea.vmem %s34_s25, 2048  ;;  %p1070_p4 = scmp.lt.s32.totalorder %s34_s25, %s34_s25 }
   0xc   :  { %p1066_p3 = scmp.ne.s32.totalorder %s34_s25, %s1065_s12  ;;  %p1071_p5 = scmp.lt.s32.totalorder %s1065_s12, %s1065_s12 }
   0xe   :  { %p1072_p6 = por %p1071_p5, %p1070_p4 }
  0x10   :  { %p1073_p7 = pnand %p1072_p6, %p1066_p3 }
  0x12   :  { %1076 = shalt.err (!%p1073_p7)
}
  0x13   :  { %s1175_s13 = smov 128   ;;  %s1176_s14 = smov 8  }
  0x14   :  { %39 = dma.hbm_to_vmem [thread:$0]  %s1361_s1, 2048, %s34_s25, [#allocation6], %s1175_s13, %s1175_s13, %s1176_s14  }
  0x15   :  { %s1077_s19 = scalar_lea.hbm %s1360_s0, 2048 }
  0x16   :  { %p1078_p8 = scmp.ne.s32.totalorder %s1360_s0, %s1077_s19  ;;  %p1081_p9 = scmp.lt.u32.totalorder %s1077_s19, %s1360_s0 }
  0x18   :  { %p1083_p10 = pnand %p1081_p9, %p1078_p8 }
  0x1a   :  { %1086 = shalt.err (!%p1083_p10)
}
  0x1b   :  { %s1087_s24 = scalar_lea.vmem %s1220_s27, 2048  ;;  %p1092_p12 = scmp.lt.s32.totalorder %s1220_s27, %s1220_s27 }
  0x1c   :  { %p1088_p11 = scmp.ne.s32.totalorder %s1220_s27, %s1087_s24  ;;  %p1093_p13 = scmp.lt.s32.totalorder %s1087_s24, %s1087_s24 }
  0x1e   :  { %p1094_p0 = por %p1093_p13, %p1092_p12 }
  0x20   :  { %p1095_p1 = pnand %p1094_p0, %p1088_p11 }
  0x22   :  { %1098 = shalt.err (!%p1095_p1)
}
  0x23   :  { %27 = dma.hbm_to_vmem [thread:$0]  %s1360_s0, 2048, %s1220_s27, [#allocation3], %s1175_s13, %s1175_s13, %s1176_s14  }
  0x24   :  { %s1177_s26 = smov [#allocation7]   ;;  %s1178_s29 = smov [#allocation8]  }
  0x25   :  { %s47_s28 = sshll.u32 %s1177_s26, 4  ;;  %s61_s30 = sshll.u32 %s1178_s29, 4  ;;  %s48_s28 = int_to_ptr.vmem [resolvable:$true] %s47_s28  ;;  %s1257_s30 = int_to_ptr.vmem [resolvable:$true] %s61_s30 }
  0x26   :  { %s1099_s10 = scalar_lea.hbm %s1363_s3, 2048 }
  0x27   :  { %p1100_p2 = scmp.ne.s32.totalorder %s1363_s3, %s1099_s10  ;;  %p1103_p3 = scmp.lt.u32.totalorder %s1099_s10, %s1363_s3 }
  0x29   :  { %p1105_p4 = pnand %p1103_p3, %p1100_p2 }
  0x2b   :  { %1108 = shalt.err (!%p1105_p4)
}
  0x2c   :  { %s1109_s0 = scalar_lea.vmem %s48_s28, 2048  ;;  %p1114_p6 = scmp.lt.s32.totalorder %s48_s28, %s48_s28 }
  0x2d   :  { %p1110_p5 = scmp.ne.s32.totalorder %s48_s28, %s1109_s0  ;;  %p1115_p7 = scmp.lt.s32.totalorder %s1109_s0, %s1109_s0 }
  0x2f   :  { %p1116_p8 = por %p1115_p7, %p1114_p6 }
  0x31   :  { %p1117_p9 = pnand %p1116_p8, %p1110_p5 }
  0x33   :  { %1120 = shalt.err (!%p1117_p9)
}
  0x34   :  { %53 = dma.hbm_to_vmem [thread:$0]  %s1363_s3, 2048, %s48_s28, [#allocation6], %s1175_s13, %s1175_s13, %s1176_s14  }
  0x35   :  { %s1121_s20 = scalar_lea.hbm %s1365_s5, 2048 }
  0x36   :  { %p1122_p10 = scmp.ne.s32.totalorder %s1365_s5, %s1121_s20  ;;  %p1125_p11 = scmp.lt.u32.totalorder %s1121_s20, %s1365_s5 }
  0x38   :  { %p1127_p12 = pnand %p1125_p11, %p1122_p10 }
  0x3a   :  { %1130 = shalt.err (!%p1127_p12)
}
  0x3b   :  { %s1131_s1 = scalar_lea.vmem %s1257_s30, 2048  ;;  %p1136_p0 = scmp.lt.s32.totalorder %s1257_s30, %s1257_s30 }
  0x3c   :  { %p1132_p13 = scmp.ne.s32.totalorder %s1257_s30, %s1131_s1  ;;  %p1137_p1 = scmp.lt.s32.totalorder %s1131_s1, %s1131_s1 }
  0x3e   :  { %p1138_p2 = por %p1137_p1, %p1136_p0 }
  0x40   :  { %p1139_p3 = pnand %p1138_p2, %p1132_p13 }
  0x42   :  { %1142 = shalt.err (!%p1139_p3)
}
  0x43   :  { %67 = dma.hbm_to_vmem [thread:$0]  %s1365_s5, 2048, %s1257_s30, [#allocation9], %s1175_s13, %s1175_s13, %s1176_s14  }
  0x44   :  { %1165 = dma.done.wait [#allocation3], 2048  }
  0x45   :  { %1166 = vsyncadd [#allocation3], 4294965248 }
  0x46   :  { %1167 = dma.done.wait [#allocation6], 4096  }
  0x47   :  { %1168 = vsyncadd [#allocation6], 4294963200 }
  0x48   :  { %1169 = dma.done.wait [#allocation9], 2048  }
  0x49   :  { %1170 = vsyncadd [#allocation9], 4294965248  ;;  %v98_v0 = vld [vmem:[#allocation5] sm:$0xff]  ;;  %v99_v1 = vld [vmem:[#allocation5 + $0x8] sm:$0xff] }
  0x4a   :  { %v100_v2 = vld [vmem:[#allocation5 + $0x10] sm:$0xff]  ;;  %v936_v3 = vpack.c.bf16 %v99_v1, %v98_v0  ;;  %v101_v4 = vld [vmem:[#allocation5 + $0x18] sm:$0xff]  ;;  %v102_v6 = vld [vmem:[#allocation5 + $0x20] sm:$0xff] }
  0x4b   :  { %v940_v5 = vpack.c.bf16 %v101_v4, %v100_v2  ;;  %v103_v7 = vld [vmem:[#allocation5 + $0x28] sm:$0xff]  ;;  %v82_v9 = vld [vmem:[#allocation2] sm:$0xff]  ;;  %v104_v10 = vld [vmem:[#allocation5 + $0x30] sm:$0xff] }
  0x4c   :  { %937 = vmatprep.subr.bf16.mxu0 %v936_v3  ;;  %v944_v8 = vpack.c.bf16 %v103_v7, %v102_v6  ;;  %v105_v11 = vld [vmem:[#allocation5 + $0x38] sm:$0xff]  ;;  %800 = vmatprep.mubr.f32.mxu0 %v82_v9  ;;  %v106_v13 = vld [vmem:[#allocation5 + $0x40] sm:$0xff]  ;;  %v107_v14 = vld [vmem:[#allocation5 + $0x48] sm:$0xff] }
  0x4d   :  { %939 = vmatpush3.bf16.msra.mxu0 %v936_v3  ;;  %v948_v12 = vpack.c.bf16 %v105_v11, %v104_v10  ;;  %v282_v15 = vld [vmem:[#allocation7] sm:$0xff]  ;;  %v283_v16 = vld [vmem:[#allocation7 + $0x8] sm:$0xff]  ;;  %v284_v17 = vld [vmem:[#allocation7 + $0x10] sm:$0xff]  ;;  %v952_v21 = vpack.c.bf16 %v107_v14, %v106_v13 }
  0x4e   :  { %941 = vmatprep.subr.bf16.mxu0 %v940_v5  ;;  %v285_v18 = vld [vmem:[#allocation7 + $0x18] sm:$0xff]  ;;  %v968_v19 = vpack.c.bf16 %v283_v16, %v282_v15  ;;  %v286_v22 = vld [vmem:[#allocation7 + $0x20] sm:$0xff]  ;;  %v287_v23 = vld [vmem:[#allocation7 + $0x28] sm:$0xff] }
  0x4f   :  { %v972_v20 = vpack.c.bf16 %v285_v18, %v284_v17  ;;  %v108_v24 = vld [vmem:[#allocation5 + $0x50] sm:$0xff]  ;;  %v109_v25 = vld [vmem:[#allocation5 + $0x58] sm:$0xff]  ;;  %v976_v26 = vpack.c.bf16 %v287_v23, %v286_v22  ;;  %v110_v30 = vld [vmem:[#allocation5 + $0x60] sm:$0xff] }
  0x50   :  { %969 = vmatprep.subr.bf16.mxu1 %v968_v19  ;;  %v956_v27 = vpack.c.bf16 %v109_v25, %v108_v24  ;;  %v288_v28 = vld [vmem:[#allocation7 + $0x30] sm:$0xff]  ;;  %v289_v29 = vld [vmem:[#allocation7 + $0x38] sm:$0xff]  ;;  %v111_v31 = vld [vmem:[#allocation5 + $0x68] sm:$0xff] }
  0x51   :  { %943 = vmatpush3.bf16.msra.mxu0 %v940_v5  ;;  %971 = vmatpush3.bf16.msra.mxu1 %v968_v19  ;;  %v980_v32 = vpack.c.bf16 %v289_v29, %v288_v28  ;;  %v960_v33 = vpack.c.bf16 %v111_v31, %v110_v30  ;;  %v290_v34 = vld [vmem:[#allocation7 + $0x40] sm:$0xff]  ;;  %v291_v35 = vld [vmem:[#allocation7 + $0x48] sm:$0xff]  ;;  %v112_v36 = vld [vmem:[#allocation5 + $0x70] sm:$0xff] }
  0x52   :  { %945 = vmatprep.subr.bf16.mxu0 %v944_v8  ;;  %973 = vmatprep.subr.bf16.mxu1 %v972_v20  ;;  %v113_v37 = vld [vmem:[#allocation5 + $0x78] sm:$0xff]  ;;  %v984_v38 = vpack.c.bf16 %v291_v35, %v290_v34  ;;  %v292_v40 = vld [vmem:[#allocation7 + $0x50] sm:$0xff]  ;;  %v294_v43 = vld [vmem:[#allocation7 + $0x60] sm:$0xff] }
  0x53   :  { %v964_v39 = vpack.c.bf16 %v113_v37, %v112_v36  ;;  %v293_v41 = vld [vmem:[#allocation7 + $0x58] sm:$0xff]  ;;  %v295_v44 = vld [vmem:[#allocation7 + $0x68] sm:$0xff]  ;;  %v84_v47 = vld [vmem:[#allocation2 + $0x10] sm:$0xff] }
  0x54   :  { %v988_v42 = vpack.c.bf16 %v293_v41, %v292_v40  ;;  %v83_v45 = vld [vmem:[#allocation2 + $0x8] sm:$0xff]  ;;  %v992_v46 = vpack.c.bf16 %v295_v44, %v294_v43  ;;  %v85_v48 = vld [vmem:[#allocation2 + $0x18] sm:$0xff]  ;;  %v86_v49 = vld [vmem:[#allocation2 + $0x20] sm:$0xff] }
  0x55   :  { %947 = vmatpush3.bf16.msra.mxu0 %v944_v8  ;;  %975 = vmatpush3.bf16.msra.mxu1 %v972_v20  ;;  %v87_v50 = vld [vmem:[#allocation2 + $0x28] sm:$0xff]  ;;  %v88_v51 = vld [vmem:[#allocation2 + $0x30] sm:$0xff]  ;;  %v89_v52 = vld [vmem:[#allocation2 + $0x38] sm:$0xff] }
  0x56   :  { %949 = vmatprep.subr.bf16.mxu0 %v948_v12  ;;  %977 = vmatprep.subr.bf16.mxu1 %v976_v26  ;;  %v90_v53 = vld [vmem:[#allocation2 + $0x40] sm:$0xff]  ;;  %v91_v54 = vld [vmem:[#allocation2 + $0x48] sm:$0xff]  ;;  %v92_v55 = vld [vmem:[#allocation2 + $0x50] sm:$0xff] }
  0x57   :  { %v93_v56 = vld [vmem:[#allocation2 + $0x58] sm:$0xff]  ;;  %v94_v57 = vld [vmem:[#allocation2 + $0x60] sm:$0xff]  ;;  %v95_v58 = vld [vmem:[#allocation2 + $0x68] sm:$0xff] }
  0x58   :  { %v96_v59 = vld [vmem:[#allocation2 + $0x70] sm:$0xff]  ;;  %v97_v60 = vld [vmem:[#allocation2 + $0x78] sm:$0xff]  ;;  %v466_v0 = vld [vmem:[#allocation8] sm:$0xff] }
  0x59   :  { %951 = vmatpush3.bf16.msra.mxu0 %v948_v12  ;;  %979 = vmatpush3.bf16.msra.mxu1 %v976_v26  ;;  %v296_v61 = vld [vmem:[#allocation7 + $0x70] sm:$0xff]  ;;  %v297_v62 = vld [vmem:[#allocation7 + $0x78] sm:$0xff]  ;;  %v467_v1 = vld [vmem:[#allocation8 + $0x8] sm:$0xff] }
  0x5a   :  { %953 = vmatprep.subr.bf16.mxu0 %v952_v21  ;;  %981 = vmatprep.subr.bf16.mxu1 %v980_v32  ;;  %v996_v63 = vpack.c.bf16 %v297_v62, %v296_v61  ;;  %v468_v2 = vld [vmem:[#allocation8 + $0x10] sm:$0xff]  ;;  %v1000_v3 = vpack.c.bf16 %v467_v1, %v466_v0  ;;  %v469_v4 = vld [vmem:[#allocation8 + $0x18] sm:$0xff]  ;;  %v470_v6 = vld [vmem:[#allocation8 + $0x20] sm:$0xff] }
  0x5b   :  { %v1004_v5 = vpack.c.bf16 %v469_v4, %v468_v2  ;;  %v471_v7 = vld [vmem:[#allocation8 + $0x28] sm:$0xff]  ;;  %v472_v9 = vld [vmem:[#allocation8 + $0x30] sm:$0xff]  ;;  %v473_v10 = vld [vmem:[#allocation8 + $0x38] sm:$0xff] }
  0x5c   :  { %v1008_v8 = vpack.c.bf16 %v471_v7, %v470_v6  ;;  %v1294_v11 = vpack.c.bf16 %v473_v10, %v472_v9  ;;  %v474_v12 = vld [vmem:[#allocation8 + $0x40] sm:$0xff]  ;;  %v475_v13 = vld [vmem:[#allocation8 + $0x48] sm:$0xff]  ;;  %v476_v15 = vld [vmem:[#allocation8 + $0x50] sm:$0xff] }
  0x5d   :  { %955 = vmatpush3.bf16.msra.mxu0 %v952_v21  ;;  %983 = vmatpush3.bf16.msra.mxu1 %v980_v32  ;;  %v1297_v14 = vpack.c.bf16 %v475_v13, %v474_v12  ;;  %v477_v16 = vld [vmem:[#allocation8 + $0x58] sm:$0xff]  ;;  %v478_v18 = vld [vmem:[#allocation8 + $0x60] sm:$0xff]  ;;  %v479_v19 = vld [vmem:[#allocation8 + $0x68] sm:$0xff] }
  0x5e   :  { %957 = vmatprep.subr.bf16.mxu0 %v956_v27  ;;  %985 = vmatprep.subr.bf16.mxu1 %v984_v38  ;;  %v1301_v17 = vpack.c.bf16 %v477_v16, %v476_v15  ;;  %v1305_v20 = vpack.c.bf16 %v479_v19, %v478_v18  ;;  %v1313_v21 = vld [vmem:[%s1362_s2] ss:$0 sm:$0xff]  ;;  %v480_v6 = vld [vmem:[#allocation8 + $0x70] sm:$0xff]  ;;  %v481_v7 = vld [vmem:[#allocation8 + $0x78] sm:$0xff] }
  0x5f   :  { %v670_v9 = vld [vmem:[%s1364_s4] ss:$0 sm:$0xff] }
  0x61   :  { %959 = vmatpush3.bf16.msra.mxu0 %v956_v27  ;;  %987 = vmatpush3.bf16.msra.mxu1 %v984_v38 }
  0x62   :  { %961 = vmatprep.subr.bf16.mxu0 %v960_v33  ;;  %989 = vmatprep.subr.bf16.mxu1 %v988_v42 }
  0x65   :  { %963 = vmatpush3.bf16.msra.mxu0 %v960_v33  ;;  %991 = vmatpush3.bf16.msra.mxu1 %v988_v42 }
  0x66   :  { %965 = vmatprep.subr.bf16.mxu0 %v964_v39  ;;  %993 = vmatprep.subr.bf16.mxu1 %v992_v46 }
  0x69   :  { %967 = vmatpush3.bf16.msra.mxu0 %v964_v39  ;;  %995 = vmatpush3.bf16.msra.mxu1 %v992_v46 }
  0x6a   :  { %997 = vmatprep.subr.bf16.mxu1 %v996_v63  ;;  %1001 = vmatprep.subr.bf16.mxu0 %v1000_v3 }
  0x6c   :  { %801 = vmatmul.mubr.f32.vlgmr.msra.gmra.mrb[0].mxu0 %v83_v45 }
  0x6d   :  { %803 = vmatprep.mubr.f32.mxu0 %v84_v47  ;;  %999 = vmatpush3.bf16.msra.mxu1 %v996_v63 }
  0x6e   :  { %1032 = vmatprep.subr.bf16.mxu1 %v1000_v3  ;;  %1003 = vmatpush3.bf16.msra.mxu0 %v1000_v3 }
  0x6f   :  { %1005 = vmatprep.subr.bf16.mxu0 %v1004_v5 }
  0x70   :  { %804 = vmatmul.mubr.f32.gmra.mrb[2].mxu0 %v85_v48 }
  0x71   :  { %806 = vmatprep.mubr.f32.mxu0 %v86_v49 }
  0x72   :  { %1007 = vmatpush3.bf16.msra.mxu0 %v1004_v5 }
  0x73   :  { %1009 = vmatprep.subr.bf16.mxu0 %v1008_v8 }
  0x74   :  { %807 = vmatmul.mubr.f32.gmra.mrb[4].mxu0 %v87_v50 }
  0x75   :  { %809 = vmatprep.mubr.f32.mxu0 %v88_v51 }
  0x76   :  { %1011 = vmatpush3.bf16.msra.mxu0 %v1008_v8 }
  0x77   :  { %1013 = vmatprep.subr.bf16.mxu0 %v1294_v11 }
  0x78   :  { %810 = vmatmul.mubr.f32.gmra.mrb[6].mxu0 %v89_v52 }
  0x79   :  { %812 = vmatprep.mubr.f32.mxu0 %v90_v53 }
  0x7a   :  { %1015 = vmatpush3.bf16.msra.mxu0 %v1294_v11 }
  0x7b   :  { %1017 = vmatprep.subr.bf16.mxu0 %v1297_v14 }
  0x7c   :  { %813 = vmatmul.mubr.f32.gmra.mrb[8].mxu0 %v91_v54 }
  0x7d   :  { %815 = vmatprep.mubr.f32.mxu0 %v92_v55 }
  0x7e   :  { %1019 = vmatpush3.bf16.msra.mxu0 %v1297_v14 }
  0x7f   :  { %1021 = vmatprep.subr.bf16.mxu0 %v1301_v17 }
  0x80   :  { %816 = vmatmul.mubr.f32.gmra.mrb[10].mxu0 %v93_v56 }
  0x81   :  { %818 = vmatprep.mubr.f32.mxu0 %v94_v57 }
  0x82   :  { %1023 = vmatpush3.bf16.msra.mxu0 %v1301_v17 }
  0x83   :  { %1025 = vmatprep.subr.bf16.mxu0 %v1305_v20 }
  0x84   :  { %819 = vmatmul.mubr.f32.gmra.mrb[12].mxu0 %v95_v58 }
  0x85   :  { %821 = vmatprep.mubr.f32.mxu0 %v96_v59 }
  0x86   :  { %1027 = vmatpush3.bf16.msra.mxu0 %v1305_v20 }
  0x88   :  { %822 = vmatmul.mubr.f32.gmra.mrb[14].mxu0 %v97_v60 }
 0x13f   :  { %v802_v22 = vpop.f32.mrb[0].mxu0 }
 0x140   :  { %v193_v23 = vadd.f32 %v802_v22, %v1313_v21  ;;  %v187_v24 = vpop.f32.mrb[1].mxu0 }
 0x141   :  { %v188_v25 = vadd.f32 %v1313_v21, %v187_v24 }
 0x142   :  { %v267_v28 = vmax.f32 %v193_v23, 0.0 }
 0x143   :  { %v805_v26 = vpop.f32.mrb[2].mxu0  ;;  %v266_v27 = vmax.f32 %v188_v25, 0.0 }
 0x144   :  { %v203_v29 = vadd.f32 %v805_v26, %v1313_v21  ;;  %v197_v30 = vpop.f32.mrb[3].mxu0 }
 0x145   :  { %v198_v31 = vadd.f32 %v1313_v21, %v197_v30  ;;  %856 = vmatprep.mubr.f32.mxu1 %v266_v27 }
 0x146   :  { %857 = vmatmul.mubr.f32.vlgmr.msra.gmra.mrb[0].mxu1 %v267_v28  ;;  %v269_v34 = vmax.f32 %v203_v29, 0.0 }
 0x147   :  { %v268_v32 = vmax.f32 %v198_v31, 0.0  ;;  %v808_v33 = vpop.f32.mrb[4].mxu0  ;;  %1040 = vmatpush3.bf16.msra.mxu1 %v1000_v3 }
 0x148   :  { %v213_v35 = vadd.f32 %v808_v33, %v1313_v21  ;;  %v207_v36 = vpop.f32.mrb[5].mxu0  ;;  %1033 = vmatprep.subr.bf16.mxu1 %v1004_v5 }
 0x149   :  { %v208_v37 = vadd.f32 %v1313_v21, %v207_v36  ;;  %859 = vmatprep.mubr.f32.mxu1 %v268_v32 }
 0x14a   :  { %860 = vmatmul.mubr.f32.gmra.mrb[2].mxu1 %v269_v34  ;;  %v271_v40 = vmax.f32 %v213_v35, 0.0 }
 0x14b   :  { %v270_v38 = vmax.f32 %v208_v37, 0.0  ;;  %v811_v39 = vpop.f32.mrb[6].mxu0  ;;  %1041 = vmatpush3.bf16.msra.mxu1 %v1004_v5 }
 0x14c   :  { %v223_v41 = vadd.f32 %v811_v39, %v1313_v21  ;;  %v217_v42 = vpop.f32.mrb[7].mxu0  ;;  %1034 = vmatprep.subr.bf16.mxu1 %v1008_v8 }
 0x14d   :  { %v218_v43 = vadd.f32 %v1313_v21, %v217_v42  ;;  %862 = vmatprep.mubr.f32.mxu1 %v270_v38 }
 0x14e   :  { %863 = vmatmul.mubr.f32.gmra.mrb[4].mxu1 %v271_v40  ;;  %v273_v46 = vmax.f32 %v223_v41, 0.0 }
 0x14f   :  { %v272_v44 = vmax.f32 %v218_v43, 0.0  ;;  %v814_v45 = vpop.f32.mrb[8].mxu0  ;;  %1042 = vmatpush3.bf16.msra.mxu1 %v1008_v8  ;;  %v1028_v8 = vpack.c.bf16 %v481_v7, %v480_v6 }
 0x150   :  { %v233_v47 = vadd.f32 %v814_v45, %v1313_v21  ;;  %v227_v48 = vpop.f32.mrb[9].mxu0  ;;  %1035 = vmatprep.subr.bf16.mxu1 %v1294_v11 }
 0x151   :  { %v228_v49 = vadd.f32 %v1313_v21, %v227_v48  ;;  %865 = vmatprep.mubr.f32.mxu1 %v272_v44  ;;  %1029 = vmatprep.subr.bf16.mxu0 %v1028_v8 }
 0x152   :  { %866 = vmatmul.mubr.f32.gmra.mrb[6].mxu1 %v273_v46  ;;  %v275_v52 = vmax.f32 %v233_v47, 0.0  ;;  %1031 = vmatpush3.bf16.msra.mxu0 %v1028_v8 }
 0x153   :  { %v274_v50 = vmax.f32 %v228_v49, 0.0  ;;  %v817_v51 = vpop.f32.mrb[10].mxu0  ;;  %1043 = vmatpush3.bf16.msra.mxu1 %v1294_v11 }
 0x154   :  { %v243_v53 = vadd.f32 %v817_v51, %v1313_v21  ;;  %v237_v54 = vpop.f32.mrb[11].mxu0  ;;  %1036 = vmatprep.subr.bf16.mxu1 %v1297_v14 }
 0x155   :  { %v238_v55 = vadd.f32 %v1313_v21, %v237_v54  ;;  %868 = vmatprep.mubr.f32.mxu1 %v274_v50 }
 0x156   :  { %869 = vmatmul.mubr.f32.gmra.mrb[8].mxu1 %v275_v52  ;;  %v277_v58 = vmax.f32 %v243_v53, 0.0 }
 0x157   :  { %v276_v56 = vmax.f32 %v238_v55, 0.0  ;;  %v820_v57 = vpop.f32.mrb[12].mxu0  ;;  %1044 = vmatpush3.bf16.msra.mxu1 %v1297_v14 }
 0x158   :  { %v253_v59 = vadd.f32 %v820_v57, %v1313_v21  ;;  %v247_v60 = vpop.f32.mrb[13].mxu0  ;;  %1037 = vmatprep.subr.bf16.mxu1 %v1301_v17 }
 0x159   :  { %v248_v61 = vadd.f32 %v1313_v21, %v247_v60  ;;  %871 = vmatprep.mubr.f32.mxu1 %v276_v56 }
 0x15a   :  { %872 = vmatmul.mubr.f32.gmra.mrb[10].mxu1 %v277_v58  ;;  %v279_v0 = vmax.f32 %v253_v59, 0.0  ;;  %v671_v58 = vld [vmem:[%s1366_s6] ss:$0 sm:$0xff]  ;;  %s1179_s6 = smov [#allocation10]  }
 0x15b   :  { %v278_v62 = vmax.f32 %v248_v61, 0.0  ;;  %v823_v63 = vpop.f32.mrb[14].mxu0  ;;  %1045 = vmatpush3.bf16.msra.mxu1 %v1301_v17  ;;  %s655_s30 = sshll.u32 %s1179_s6, 4  ;;  %s656_s30 = int_to_ptr.vmem [resolvable:$true] %s655_s30 }
 0x15c   :  { %v263_v1 = vadd.f32 %v823_v63, %v1313_v21  ;;  %v257_v2 = vpop.f32.mrb[15].mxu0  ;;  %1038 = vmatprep.subr.bf16.mxu1 %v1305_v20  ;;  %s1143_s8 = scalar_lea.vmem %s656_s30, 2048  ;;  %p1148_p5 = scmp.lt.s32.totalorder %s656_s30, %s656_s30 }
 0x15d   :  { %v258_v3 = vadd.f32 %v1313_v21, %v257_v2  ;;  %874 = vmatprep.mubr.f32.mxu1 %v278_v62  ;;  %p1144_p4 = scmp.ne.s32.totalorder %s656_s30, %s1143_s8  ;;  %p1149_p6 = scmp.lt.s32.totalorder %s1143_s8, %s1143_s8 }
 0x15e   :  { %875 = vmatmul.mubr.f32.gmra.mrb[12].mxu1 %v279_v0  ;;  %v281_v5 = vmax.f32 %v263_v1, 0.0 }
 0x15f   :  { %v280_v4 = vmax.f32 %v258_v3, 0.0  ;;  %1046 = vmatpush3.bf16.msra.mxu1 %v1305_v20  ;;  %p1150_p7 = por %p1149_p6, %p1148_p5 }
 0x160   :  { %1039 = vmatprep.subr.bf16.mxu1 %v1028_v8 }
 0x161   :  { %877 = vmatprep.mubr.f32.mxu1 %v280_v4  ;;  %p1151_p8 = pnand %p1150_p7, %p1144_p4 }
 0x162   :  { %878 = vmatmul.mubr.f32.gmra.mrb[14].mxu1 %v281_v5 }
 0x163   :  { %1047 = vmatpush3.bf16.msra.mxu1 %v1028_v8 }
 0x219   :  { %v858_v10 = vpop.f32.mrb[0].mxu1 }
 0x21a   :  { %v377_v11 = vadd.f32 %v858_v10, %v670_v9  ;;  %v371_v12 = vpop.f32.mrb[1].mxu1 }
 0x21b   :  { %v372_v13 = vadd.f32 %v670_v9, %v371_v12 }
 0x21c   :  { %v451_v16 = vmax.f32 %v377_v11, 0.0 }
 0x21d   :  { %v450_v14 = vmax.f32 %v372_v13, 0.0  ;;  %v861_v15 = vpop.f32.mrb[2].mxu1 }
 0x21e   :  { %v387_v17 = vadd.f32 %v861_v15, %v670_v9  ;;  %v381_v18 = vpop.f32.mrb[3].mxu1 }
 0x21f   :  { %v382_v19 = vadd.f32 %v670_v9, %v381_v18  ;;  %912 = vmatprep.mubr.f32.mxu0 %v450_v14 }
 0x220   :  { %913 = vmatmul.mubr.f32.vlgmr.msra.gmra.mrb[16].mxu0 %v451_v16  ;;  %v453_v22 = vmax.f32 %v387_v17, 0.0 }
 0x221   :  { %v452_v20 = vmax.f32 %v382_v19, 0.0  ;;  %v864_v21 = vpop.f32.mrb[4].mxu1 }
 0x222   :  { %v397_v23 = vadd.f32 %v864_v21, %v670_v9  ;;  %v391_v24 = vpop.f32.mrb[5].mxu1 }
 0x223   :  { %v392_v25 = vadd.f32 %v670_v9, %v391_v24  ;;  %915 = vmatprep.mubr.f32.mxu0 %v452_v20 }
 0x224   :  { %916 = vmatmul.mubr.f32.gmra.mrb[18].mxu0 %v453_v22  ;;  %v455_v28 = vmax.f32 %v397_v23, 0.0 }
 0x225   :  { %v454_v26 = vmax.f32 %v392_v25, 0.0  ;;  %v867_v27 = vpop.f32.mrb[6].mxu1 }
 0x226   :  { %v407_v29 = vadd.f32 %v867_v27, %v670_v9  ;;  %v401_v30 = vpop.f32.mrb[7].mxu1 }
 0x227   :  { %v402_v31 = vadd.f32 %v670_v9, %v401_v30  ;;  %918 = vmatprep.mubr.f32.mxu0 %v454_v26 }
 0x228   :  { %919 = vmatmul.mubr.f32.gmra.mrb[20].mxu0 %v455_v28  ;;  %v457_v34 = vmax.f32 %v407_v29, 0.0 }
 0x229   :  { %v456_v32 = vmax.f32 %v402_v31, 0.0  ;;  %v870_v33 = vpop.f32.mrb[8].mxu1 }
 0x22a   :  { %v417_v35 = vadd.f32 %v870_v33, %v670_v9  ;;  %v411_v36 = vpop.f32.mrb[9].mxu1 }
 0x22b   :  { %v412_v37 = vadd.f32 %v670_v9, %v411_v36  ;;  %921 = vmatprep.mubr.f32.mxu0 %v456_v32 }
 0x22c   :  { %922 = vmatmul.mubr.f32.gmra.mrb[22].mxu0 %v457_v34  ;;  %v459_v40 = vmax.f32 %v417_v35, 0.0 }
 0x22d   :  { %v458_v38 = vmax.f32 %v412_v37, 0.0  ;;  %v873_v39 = vpop.f32.mrb[10].mxu1 }
 0x22e   :  { %v427_v41 = vadd.f32 %v873_v39, %v670_v9  ;;  %v421_v42 = vpop.f32.mrb[11].mxu1 }
 0x22f   :  { %v422_v43 = vadd.f32 %v670_v9, %v421_v42  ;;  %924 = vmatprep.mubr.f32.mxu1 %v458_v38 }
 0x230   :  { %925 = vmatmul.mubr.f32.vlgmr.msra.gmra.mrb[16].mxu1 %v459_v40  ;;  %v461_v46 = vmax.f32 %v427_v41, 0.0 }
 0x231   :  { %v460_v44 = vmax.f32 %v422_v43, 0.0  ;;  %v876_v45 = vpop.f32.mrb[12].mxu1 }
 0x232   :  { %v437_v47 = vadd.f32 %v876_v45, %v670_v9  ;;  %v431_v48 = vpop.f32.mrb[13].mxu1 }
 0x233   :  { %v432_v49 = vadd.f32 %v670_v9, %v431_v48  ;;  %927 = vmatprep.mubr.f32.mxu1 %v460_v44 }
 0x234   :  { %928 = vmatmul.mubr.f32.gmra.mrb[18].mxu1 %v461_v46  ;;  %v463_v52 = vmax.f32 %v437_v47, 0.0 }
 0x235   :  { %v462_v50 = vmax.f32 %v432_v49, 0.0  ;;  %v879_v51 = vpop.f32.mrb[14].mxu1 }
 0x236   :  { %v447_v53 = vadd.f32 %v879_v51, %v670_v9  ;;  %v441_v54 = vpop.f32.mrb[15].mxu1 }
 0x237   :  { %v442_v55 = vadd.f32 %v670_v9, %v441_v54  ;;  %930 = vmatprep.mubr.f32.mxu1 %v462_v50 }
 0x238   :  { %931 = vmatmul.mubr.f32.gmra.mrb[20].mxu1 %v463_v52  ;;  %v465_v57 = vmax.f32 %v447_v53, 0.0 }
 0x239   :  { %v464_v56 = vmax.f32 %v442_v55, 0.0 }
 0x23b   :  { %933 = vmatprep.mubr.f32.mxu1 %v464_v56 }
 0x23c   :  { %934 = vmatmul.mubr.f32.gmra.mrb[22].mxu1 %v465_v57 }
 0x2f3   :  { %v914_v59 = vpop.f32.mrb[16].mxu0 }
 0x2f4   :  { %v561_v60 = vadd.f32 %v914_v59, %v671_v58  ;;  %v555_v61 = vpop.f32.mrb[17].mxu0 }
 0x2f5   :  { %v556_v62 = vadd.f32 %v671_v58, %v555_v61 }
 0x2f6   :  { %635 = vst [vmem:[#allocation10 + $0x8] sm:$0xff] %v561_v60 }
 0x2f7   :  { %634 = vst [vmem:[#allocation10] sm:$0xff] %v556_v62  ;;  %v917_v63 = vpop.f32.mrb[18].mxu0 }
 0x2f8   :  { %v571_v0 = vadd.f32 %v917_v63, %v671_v58  ;;  %v565_v1 = vpop.f32.mrb[19].mxu0 }
 0x2f9   :  { %v566_v2 = vadd.f32 %v671_v58, %v565_v1 }
 0x2fa   :  { %637 = vst [vmem:[#allocation10 + $0x18] sm:$0xff] %v571_v0 }
 0x2fb   :  { %636 = vst [vmem:[#allocation10 + $0x10] sm:$0xff] %v566_v2  ;;  %v920_v3 = vpop.f32.mrb[20].mxu0 }
 0x2fc   :  { %v581_v4 = vadd.f32 %v920_v3, %v671_v58  ;;  %v575_v5 = vpop.f32.mrb[21].mxu0 }
 0x2fd   :  { %v576_v6 = vadd.f32 %v671_v58, %v575_v5 }
 0x2fe   :  { %639 = vst [vmem:[#allocation10 + $0x28] sm:$0xff] %v581_v4 }
 0x2ff   :  { %638 = vst [vmem:[#allocation10 + $0x20] sm:$0xff] %v576_v6  ;;  %v923_v7 = vpop.f32.mrb[22].mxu0 }
 0x300   :  { %v591_v8 = vadd.f32 %v923_v7, %v671_v58  ;;  %v585_v9 = vpop.f32.mrb[23].mxu0 }
 0x301   :  { %v586_v10 = vadd.f32 %v671_v58, %v585_v9 }
 0x302   :  { %641 = vst [vmem:[#allocation10 + $0x38] sm:$0xff] %v591_v8 }
 0x303   :  { %640 = vst [vmem:[#allocation10 + $0x30] sm:$0xff] %v586_v10  ;;  %v926_v11 = vpop.f32.mrb[16].mxu1 }
 0x304   :  { %v601_v12 = vadd.f32 %v926_v11, %v671_v58  ;;  %v595_v13 = vpop.f32.mrb[17].mxu1 }
 0x305   :  { %v596_v14 = vadd.f32 %v671_v58, %v595_v13 }
 0x306   :  { %643 = vst [vmem:[#allocation10 + $0x48] sm:$0xff] %v601_v12 }
 0x307   :  { %642 = vst [vmem:[#allocation10 + $0x40] sm:$0xff] %v596_v14  ;;  %v929_v15 = vpop.f32.mrb[18].mxu1 }
 0x308   :  { %v611_v16 = vadd.f32 %v929_v15, %v671_v58  ;;  %v605_v17 = vpop.f32.mrb[19].mxu1 }
 0x309   :  { %v606_v18 = vadd.f32 %v671_v58, %v605_v17 }
 0x30a   :  { %645 = vst [vmem:[#allocation10 + $0x58] sm:$0xff] %v611_v16 }
 0x30b   :  { %644 = vst [vmem:[#allocation10 + $0x50] sm:$0xff] %v606_v18  ;;  %v932_v19 = vpop.f32.mrb[20].mxu1 }
 0x30c   :  { %v621_v20 = vadd.f32 %v932_v19, %v671_v58  ;;  %v615_v21 = vpop.f32.mrb[21].mxu1 }
 0x30d   :  { %v616_v22 = vadd.f32 %v671_v58, %v615_v21 }
 0x30e   :  { %647 = vst [vmem:[#allocation10 + $0x68] sm:$0xff] %v621_v20 }
 0x30f   :  { %646 = vst [vmem:[#allocation10 + $0x60] sm:$0xff] %v616_v22  ;;  %v935_v23 = vpop.f32.mrb[22].mxu1 }
 0x310   :  { %v631_v24 = vadd.f32 %v935_v23, %v671_v58  ;;  %v625_v25 = vpop.f32.mrb[23].mxu1 }
 0x311   :  { %v626_v26 = vadd.f32 %v671_v58, %v625_v25 }
 0x312   :  { %649 = vst [vmem:[#allocation10 + $0x78] sm:$0xff] %v631_v24 }
 0x313   :  { %648 = vst [vmem:[#allocation10 + $0x70] sm:$0xff] %v626_v26 }
 0x314   :  { %1154 = shalt.err (!%p1151_p8)
}
 0x315   :  { %s1155_s11 = scalar_lea.hbm %s1367_s7, 2048 }
 0x316   :  { %p1156_p9 = scmp.ne.s32.totalorder %s1367_s7, %s1155_s11  ;;  %p1159_p10 = scmp.lt.u32.totalorder %s1155_s11, %s1367_s7 }
 0x318   :  { %p1161_p11 = pnand %p1159_p10, %p1156_p9 }
 0x31a   :  { %1164 = shalt.err (!%p1161_p11)
}
 0x31b   :  { %661 = dma.vmem_to_hbm [thread:$0]  %s656_s30, 2048, %s1367_s7, [#allocation4], %s1175_s13, %s1175_s13, %s1176_s14  }
 0x31c   :  { %1171 = dma.done.wait [#allocation4], 2048  }
 0x31d   :  { %1172 = vsyncadd [#allocation4], 4294965248 }
 0x31e   :  { %665 = vsyncpa [#allocation3], 1 }
 0x31f   :  { %666 = vsyncpa [#allocation6], 1 }
 0x320   :  { %667 = vsyncpa [#allocation9], 1 }
 0x321   :  { %668 = vsyncpa [#allocation4], 1 }

</bundles_post_ra>
